<compile_context>
chip_gen: v7x
topology: tpu7x:2x2x1
jax: 0.10.0
libtpu: 0.0.40
codegen_flags: <defaults>
</compile_context>

<pallas_src>
import math

import jax
import jax.numpy as jnp
from jax.experimental import pallas as pl
from jax.experimental.pallas import tpu as pltpu

LANE = 128   # TPU lane width — all packed blocks padded to this many lanes
SUB = 8      # sublane granularity — all packed blocks start on 8-aligned rows


def _mish(x):
    # Mish(x) = x * tanh(softplus(x));  mish(0) == 0 (keeps zero-padded lanes zero)
    return x * jnp.tanh(jax.nn.softplus(x))


def _pad8(n):
    return ((n + SUB - 1) // SUB) * SUB


def _pad_to(a, rows, cols):
    r, c = a.shape
    return jnp.pad(a, ((0, rows - r), (0, cols - c)))


def _make_kernel(off, a_rows, c_rows):
    """Build the fused kernel with static packed-buffer row offsets baked in."""
    f32 = jnp.float32

    def kernel(x_ref, cond_ref, sig_ref, buf_ref, out_ref):
        # --- SinusoidalPosEmb(sigma): freqs row is precomputed & packed ------
        freqs = buf_ref[off["freq"]:off["freq"] + 1, :]          # (1,128) zeros past half
        emb = sig_ref[...] * freqs                               # (TB,128)
        s = jnp.sin(emb)                                         # padded lanes: sin(0)=0
        c = jnp.cos(emb)                                         # padded lanes: cos(0)=1 -> hit zero weight rows

        # --- embed MLP first layer + Mish (concat-free split matmul) ---------
        h = (jnp.dot(s, buf_ref[off["we1s"]:off["we1s"] + LANE, :], preferred_element_type=f32)
             + jnp.dot(c, buf_ref[off["we1c"]:off["we1c"] + LANE, :], preferred_element_type=f32)
             + buf_ref[off["be1"]:off["be1"] + 1, :])
        h = _mish(h)                                             # (TB,128), padded lanes stay 0

        # --- fused [embed-Linear2 ∘ MLP-Linear1 ∘ MLP-Linear2] ---------------
        pre = (jnp.dot(x_ref[...], buf_ref[off["wx"]:off["wx"] + a_rows, :], preferred_element_type=f32)
               + jnp.dot(cond_ref[...], buf_ref[off["wc"]:off["wc"] + c_rows, :], preferred_element_type=f32)
               + jnp.dot(h, buf_ref[off["we"]:off["we"] + LANE, :], preferred_element_type=f32)
               + buf_ref[off["bf"]:off["bf"] + 1, :])
        h2 = _mish(pre)                                          # (TB,128)

        # --- output Linear (lane-dense, unmasked store) ----------------------
        out = (jnp.dot(h2, buf_ref[off["w3"]:off["w3"] + LANE, :], preferred_element_type=f32)
               + buf_ref[off["b3"]:off["b3"] + 1, :])
        out_ref[...] = out.astype(out_ref.dtype)

    return kernel


def prepare_score_network(params, action_dim, cond_dim):
    """One-time (offline) weight fusion + packing. Returns a reusable 'plan'."""
    f32 = jnp.float32
    A, C = action_dim, cond_dim
    T = params["we2"].shape[1]
    half = T // 2
    H = params["w2"].shape[0]
    O = params["w3"].shape[1]
    assert half >= 2, "time_embed_dim must be >= 4 (SinusoidalPosEmb divides by half-1)"
    assert 2 * T <= LANE and H <= LANE and O <= LANE, "pack layout assumes feature dims <= 128"

    we1 = params["we1"].astype(f32)                      # (T, 2T)
    be1 = params["be1"].astype(f32).reshape(1, -1)       # (1, 2T)
    we2 = params["we2"].astype(f32)                      # (2T, T)
    be2 = params["be2"].astype(f32).reshape(1, -1)       # (1, T)
    w1 = params["w1"].astype(f32)                        # (A+C+T, H)
    b1 = params["b1"].astype(f32).reshape(1, -1)
    w2 = params["w2"].astype(f32)                        # (H, H)
    b2 = params["b2"].astype(f32).reshape(1, -1)
    w3 = params["w3"].astype(f32)                        # (H, O)
    b3 = params["b3"].astype(f32).reshape(1, -1)

    # split concat-matmul weights
    w1x, w1c, w1e = w1[:A], w1[A:A + C], w1[A + C:]
    # fuse Linear(in,H) -> Linear(H,H) (no nonlinearity in between) and fold the
    # embed MLP's second Linear through it.
    w1e_w2 = w1e @ w2
    Wx = w1x @ w2                                        # (A, H)
    Wc = w1c @ w2                                        # (C, H)
    We = we2 @ w1e_w2                                    # (2T, H)
    bf = b1 @ w2 + b2 + be2 @ w1e_w2                     # (1, H)

    # SinusoidalPosEmb frequency row (precomputed; matches reference half-1 scale)
    freqs = jnp.exp(
        jnp.arange(half, dtype=f32) * (-(math.log(10000.0) / (half - 1)))
    ).reshape(1, half)

    # Pack everything into one lane-dense (R, 128) buffer, 8-aligned row blocks.
    blocks = [
        ("freq", freqs,      SUB),    # row 0 = freqs, zeros past `half`
        ("we1s", we1[:half], LANE),   # sin half of embed Linear1 (zero rows past half)
        ("we1c", we1[half:], LANE),   # cos half (zero rows absorb cos(0)=1 padded lanes)
        ("be1",  be1,        SUB),
        ("wx",   Wx,         _pad8(A)),
        ("wc",   Wc,         _pad8(C)),
        ("we",   We,         LANE),
        ("bf",   bf,         SUB),
        ("w3",   w3,         LANE),
        ("b3",   b3,         SUB),
    ]
    off, rows, r = {}, [], 0
    for name, mat, height in blocks:
        off[name] = r
        rows.append(_pad_to(mat, height, LANE))
        r += height
    packed = jnp.concatenate(rows, axis=0)               # (R, 128) f32, ~R*512 bytes

    return {
        "packed": packed,
        "kernel": _make_kernel(off, A, C),
        "A": A, "C": C, "O": O,
    }


def score_network_forward(x, cond, sigma, plan):
    """x: (B, A), cond: (B, C), sigma: scalar / (B,) / (B,1) -> (B, output_dim)."""
    B = x.shape[0]
    A, C, O = plan["A"], plan["C"], plan["O"]
    assert x.shape[1] == A and cond.shape[1] == C

    # batch tiling: TB sublane-aligned; weights stay VMEM-resident across tiles
    Bp = _pad8(B)
    TB = Bp if Bp <= 256 else 256
    if Bp % TB:
        Bp = ((Bp + TB - 1) // TB) * TB

    x = x.astype(jnp.float32)
    cond = cond.astype(jnp.float32)
    sigma = jnp.asarray(sigma, dtype=jnp.float32).reshape(-1)
    if sigma.shape[0] == 1 and B > 1:
        sigma = jnp.broadcast_to(sigma, (B,))
    if Bp != B:
        pad = Bp - B
        x = jnp.pad(x, ((0, pad), (0, 0)))
        cond = jnp.pad(cond, ((0, pad), (0, 0)))
        sigma = jnp.pad(sigma, ((0, pad),))
    sig2d = sigma.reshape(Bp, 1)

    packed = plan["packed"]
    out = pl.pallas_call(
        plan["kernel"],
        out_shape=jax.ShapeDtypeStruct((Bp, LANE), jnp.float32),   # lane-dense output
        grid_spec=pltpu.PrefetchScalarGridSpec(
            num_scalar_prefetch=0,
            grid=(Bp // TB,),
            in_specs=[
                pl.BlockSpec((TB, A), lambda i: (i, 0)),
                pl.BlockSpec((TB, C), lambda i: (i, 0)),
                pl.BlockSpec((TB, 1), lambda i: (i, 0)),
                pl.BlockSpec(packed.shape, lambda i: (0, 0)),      # resident weights: 1 DMA
            ],
            out_specs=pl.BlockSpec((TB, LANE), lambda i: (i, 0)),
        ),
        compiler_params=pltpu.CompilerParams(
            dimension_semantics=("parallel",)),
    )(x, cond, sig2d, packed)
    return out[:B, :O]


def make_params(key, action_dim, cond_dim, time_embed_dim, hidden_dim, output_dim):
    """Deterministic synthetic parameter init. Weights stored (in, out)."""
    T = time_embed_dim
    in_dim = action_dim + cond_dim + T
    ks = jax.random.split(key, 10)

    def w(k, shape):
        return (0.1 * jax.random.normal(k, shape)).astype(jnp.float32)

    return {
        # embed MLP
        "we1": w(ks[0], (T, 2 * T)),
        "be1": w(ks[1], (1, 2 * T)),
        "we2": w(ks[2], (2 * T, T)),
        "be2": w(ks[3], (1, T)),
        # MLPNetwork (num_hidden_layers=2): Linear, Linear, Mish, Linear
        "w1": w(ks[4], (in_dim, hidden_dim)),
        "b1": w(ks[5], (1, hidden_dim)),
        "w2": w(ks[6], (hidden_dim, hidden_dim)),
        "b2": w(ks[7], (1, hidden_dim)),
        "w3": w(ks[8], (hidden_dim, output_dim)),
        "b3": w(ks[9], (1, output_dim)),
    }


def reference_forward(x, cond, sigma, params):
    """Pure-JAX reference mirroring the PyTorch forward (for verification)."""
    T = params["we2"].shape[1]
    half = T // 2
    sig = sigma.reshape(-1, 1)
    freqs = jnp.exp(jnp.arange(half, dtype=jnp.float32) * (-math.log(10000.0) / (half - 1)))
    emb = sig * freqs[None, :]
    emb = jnp.concatenate([jnp.sin(emb), jnp.cos(emb)], axis=-1)
    h = _mish(emb @ params["we1"] + params["be1"])
    embed = h @ params["we2"] + params["be2"]
    xin = jnp.concatenate([x, cond, embed], axis=-1)
    h1 = xin @ params["w1"] + params["b1"]
    h2 = _mish(h1 @ params["w2"] + params["b2"])
    return h2 @ params["w3"] + params["b3"]


if __name__ == "__main__":
    # Small shapes consistent with the module.
    B, action_dim, cond_dim = 8, 8, 8
    time_embed_dim, hidden_dim, output_dim = 16, 32, 8

    key = jax.random.PRNGKey(0)
    kx, kc, ks, kp = jax.random.split(key, 4)
    x = jax.random.normal(kx, (B, action_dim), dtype=jnp.float32)
    cond = jax.random.normal(kc, (B, cond_dim), dtype=jnp.float32)
    sigma = jax.random.uniform(ks, (B,), dtype=jnp.float32) * 2.0

    params = make_params(kp, action_dim, cond_dim, time_embed_dim, hidden_dim, output_dim)
    plan = prepare_score_network(params, action_dim, cond_dim)   # one-time offline prep

    out = score_network_forward(x, cond, sigma, plan)
    out = jax.block_until_ready(out)

    ref = reference_forward(x, cond, sigma, params)
    assert out.shape == (B, output_dim)
    # offline Linear-Linear fusion is mathematically identical but reassociates f32 ops
    assert jnp.allclose(out, ref, atol=5e-4, rtol=5e-4), (
        f"kernel/reference mismatch, max abs err {jnp.max(jnp.abs(out - ref))}")
    print("KERNEL_OK")
</pallas_src>

<mosaic_0001>
module attributes {stable_mosaic.version = 11 : i64} {
  func.func @kernel(%arg0: i32, %arg1: memref<8x8xf32, #tpu.memory_space<vmem>>, %arg2: memref<8x8xf32, #tpu.memory_space<vmem>>, %arg3: memref<8x1xf32, #tpu.memory_space<vmem>>, %arg4: memref<560x128xf32, #tpu.memory_space<vmem>>, %arg5: memref<8x128xf32, #tpu.memory_space<vmem>>) attributes {dimension_semantics = [#tpu.dimension_semantics<parallel>], iteration_bounds = array<i64: 1>, scalar_prefetch = 0 : i64, scratch_operands = 0 : i64, tpu.core_type = #tpu.core_type<tc>, window_params = [{transform_indices = @transform_0, window_bounds = array<i64: 8, 8>}, {transform_indices = @transform_1, window_bounds = array<i64: 8, 8>}, {transform_indices = @transform_2, window_bounds = array<i64: 8, 1>}, {pipeline_mode = #tpu.pipeline_mode<synchronous>, transform_indices = @transform_3, window_bounds = array<i64: 560, 128>}, {transform_indices = @transform_4, window_bounds = array<i64: 8, 128>}]} {
    %c0 = arith.constant 0 : index
    %c0_0 = arith.constant 0 : index
    %0 = vector.load %arg4[%c0, %c0_0] : memref<560x128xf32, #tpu.memory_space<vmem>>, vector<1x128xf32>
    %c0_1 = arith.constant 0 : index
    %c0_2 = arith.constant 0 : index
    %1 = vector.load %arg3[%c0_1, %c0_2] : memref<8x1xf32, #tpu.memory_space<vmem>>, vector<8x1xf32>
    %2 = vector.broadcast %1 : vector<8x1xf32> to vector<8x128xf32>
    %3 = vector.broadcast %0 : vector<1x128xf32> to vector<8x128xf32>
    %4 = arith.mulf %2, %3 : vector<8x128xf32>
    %5 = math.sin %4 : vector<8x128xf32>
    %6 = math.cos %4 : vector<8x128xf32>
    %c8 = arith.constant 8 : index
    %c0_3 = arith.constant 0 : index
    %7 = vector.load %arg4[%c8, %c0_3] : memref<560x128xf32, #tpu.memory_space<vmem>>, vector<128x128xf32>
    %cst = arith.constant dense<0.000000e+00> : vector<8x128xf32>
    %8 = tpu.matmul %5, %7, %cst {dimension_numbers = #tpu.dot_dimension_numbers<[1], [0], [0], [1], [0, 0, 1, 1], [], []>} : vector<8x128xf32>, vector<128x128xf32>, vector<8x128xf32> -> vector<8x128xf32>
    %c136 = arith.constant 136 : index
    %c0_4 = arith.constant 0 : index
    %9 = vector.load %arg4[%c136, %c0_4] : memref<560x128xf32, #tpu.memory_space<vmem>>, vector<128x128xf32>
    %cst_5 = arith.constant dense<0.000000e+00> : vector<8x128xf32>
    %10 = tpu.matmul %6, %9, %cst_5 {dimension_numbers = #tpu.dot_dimension_numbers<[1], [0], [0], [1], [0, 0, 1, 1], [], []>} : vector<8x128xf32>, vector<128x128xf32>, vector<8x128xf32> -> vector<8x128xf32>
    %11 = arith.addf %8, %10 : vector<8x128xf32>
    %c264 = arith.constant 264 : index
    %c0_6 = arith.constant 0 : index
    %12 = vector.load %arg4[%c264, %c0_6] : memref<560x128xf32, #tpu.memory_space<vmem>>, vector<1x128xf32>
    %13 = vector.broadcast %12 : vector<1x128xf32> to vector<8x128xf32>
    %14 = arith.addf %11, %13 : vector<8x128xf32>
    %cst_7 = arith.constant 0.000000e+00 : f32
    %15 = vector.broadcast %cst_7 : f32 to vector<8x128xf32>
    %16 = arith.maximumf %14, %15 : vector<8x128xf32>
    %17 = vector.broadcast %cst_7 : f32 to vector<8x128xf32>
    %18 = arith.subf %14, %17 : vector<8x128xf32>
    %19 = arith.cmpf one, %18, %18 : vector<8x128xf32>
    %20 = vector.broadcast %cst_7 : f32 to vector<8x128xf32>
    %21 = arith.addf %14, %20 : vector<8x128xf32>
    %22 = math.absf %18 : vector<8x128xf32>
    %cst_8 = arith.constant 0.000000e+00 : f32
    %23 = vector.broadcast %cst_8 : f32 to vector<8x128xf32>
    %24 = arith.subf %23, %22 : vector<8x128xf32>
    %25 = math.exp %24 : vector<8x128xf32>
    %26 = math.log1p %25 : vector<8x128xf32>
    %27 = arith.addf %16, %26 : vector<8x128xf32>
    %28 = arith.select %19, %21, %27 : vector<8x128xi1>, vector<8x128xf32>
    %29 = math.tanh %28 : vector<8x128xf32>
    %30 = arith.mulf %14, %29 : vector<8x128xf32>
    %c0_9 = arith.constant 0 : index
    %c0_10 = arith.constant 0 : index
    %31 = vector.load %arg1[%c0_9, %c0_10] : memref<8x8xf32, #tpu.memory_space<vmem>>, vector<8x8xf32>
    %c272 = arith.constant 272 : index
    %c0_11 = arith.constant 0 : index
    %32 = vector.load %arg4[%c272, %c0_11] : memref<560x128xf32, #tpu.memory_space<vmem>>, vector<8x128xf32>
    %cst_12 = arith.constant dense<0.000000e+00> : vector<8x128xf32>
    %33 = tpu.matmul %31, %32, %cst_12 {dimension_numbers = #tpu.dot_dimension_numbers<[1], [0], [0], [1], [0, 0, 1, 1], [], []>} : vector<8x8xf32>, vector<8x128xf32>, vector<8x128xf32> -> vector<8x128xf32>
    %c0_13 = arith.constant 0 : index
    %c0_14 = arith.constant 0 : index
    %34 = vector.load %arg2[%c0_13, %c0_14] : memref<8x8xf32, #tpu.memory_space<vmem>>, vector<8x8xf32>
    %c280 = arith.constant 280 : index
    %c0_15 = arith.constant 0 : index
    %35 = vector.load %arg4[%c280, %c0_15] : memref<560x128xf32, #tpu.memory_space<vmem>>, vector<8x128xf32>
    %cst_16 = arith.constant dense<0.000000e+00> : vector<8x128xf32>
    %36 = tpu.matmul %34, %35, %cst_16 {dimension_numbers = #tpu.dot_dimension_numbers<[1], [0], [0], [1], [0, 0, 1, 1], [], []>} : vector<8x8xf32>, vector<8x128xf32>, vector<8x128xf32> -> vector<8x128xf32>
    %37 = arith.addf %33, %36 : vector<8x128xf32>
    %c288 = arith.constant 288 : index
    %c0_17 = arith.constant 0 : index
    %38 = vector.load %arg4[%c288, %c0_17] : memref<560x128xf32, #tpu.memory_space<vmem>>, vector<128x128xf32>
    %cst_18 = arith.constant dense<0.000000e+00> : vector<8x128xf32>
    %39 = tpu.matmul %30, %38, %cst_18 {dimension_numbers = #tpu.dot_dimension_numbers<[1], [0], [0], [1], [0, 0, 1, 1], [], []>} : vector<8x128xf32>, vector<128x128xf32>, vector<8x128xf32> -> vector<8x128xf32>
    %40 = arith.addf %37, %39 : vector<8x128xf32>
    %c416 = arith.constant 416 : index
    %c0_19 = arith.constant 0 : index
    %41 = vector.load %arg4[%c416, %c0_19] : memref<560x128xf32, #tpu.memory_space<vmem>>, vector<1x128xf32>
    %42 = vector.broadcast %41 : vector<1x128xf32> to vector<8x128xf32>
    %43 = arith.addf %40, %42 : vector<8x128xf32>
    %cst_20 = arith.constant 0.000000e+00 : f32
    %44 = vector.broadcast %cst_20 : f32 to vector<8x128xf32>
    %45 = arith.maximumf %43, %44 : vector<8x128xf32>
    %46 = vector.broadcast %cst_20 : f32 to vector<8x128xf32>
    %47 = arith.subf %43, %46 : vector<8x128xf32>
    %48 = arith.cmpf one, %47, %47 : vector<8x128xf32>
    %49 = vector.broadcast %cst_20 : f32 to vector<8x128xf32>
    %50 = arith.addf %43, %49 : vector<8x128xf32>
    %51 = math.absf %47 : vector<8x128xf32>
    %cst_21 = arith.constant 0.000000e+00 : f32
    %52 = vector.broadcast %cst_21 : f32 to vector<8x128xf32>
    %53 = arith.subf %52, %51 : vector<8x128xf32>
    %54 = math.exp %53 : vector<8x128xf32>
    %55 = math.log1p %54 : vector<8x128xf32>
    %56 = arith.addf %45, %55 : vector<8x128xf32>
    %57 = arith.select %48, %50, %56 : vector<8x128xi1>, vector<8x128xf32>
    %58 = math.tanh %57 : vector<8x128xf32>
    %59 = arith.mulf %43, %58 : vector<8x128xf32>
    %c424 = arith.constant 424 : index
    %c0_22 = arith.constant 0 : index
    %60 = vector.load %arg4[%c424, %c0_22] : memref<560x128xf32, #tpu.memory_space<vmem>>, vector<128x128xf32>
    %cst_23 = arith.constant dense<0.000000e+00> : vector<8x128xf32>
    %61 = tpu.matmul %59, %60, %cst_23 {dimension_numbers = #tpu.dot_dimension_numbers<[1], [0], [0], [1], [0, 0, 1, 1], [], []>} : vector<8x128xf32>, vector<128x128xf32>, vector<8x128xf32> -> vector<8x128xf32>
    %c552 = arith.constant 552 : index
    %c0_24 = arith.constant 0 : index
    %62 = vector.load %arg4[%c552, %c0_24] : memref<560x128xf32, #tpu.memory_space<vmem>>, vector<1x128xf32>
    %63 = vector.broadcast %62 : vector<1x128xf32> to vector<8x128xf32>
    %64 = arith.addf %61, %63 : vector<8x128xf32>
    %c0_25 = arith.constant 0 : index
    %c0_26 = arith.constant 0 : index
    %65 = vector.load %arg5[%c0_25, %c0_26] : memref<8x128xf32, #tpu.memory_space<vmem>>, vector<8x128xf32>
    tpu.vector_store %arg5[%c0_25, %c0_26], %64 {strides = array<i32>} : memref<8x128xf32, #tpu.memory_space<vmem>>, vector<8x128xf32>,
    return
  }
  func.func @transform_0(%arg0: i32) -> (i32, i32) {
    %c0_i32 = arith.constant 0 : i32
    %c0_i32_0 = arith.constant 0 : i32
    return %arg0, %c0_i32 : i32, i32
  }
  func.func @transform_1(%arg0: i32) -> (i32, i32) {
    %c0_i32 = arith.constant 0 : i32
    %c0_i32_0 = arith.constant 0 : i32
    return %arg0, %c0_i32 : i32, i32
  }
  func.func @transform_2(%arg0: i32) -> (i32, i32) {
    %c0_i32 = arith.constant 0 : i32
    %c0_i32_0 = arith.constant 0 : i32
    return %arg0, %c0_i32 : i32, i32
  }
  func.func @transform_3(%arg0: i32) -> (i32, i32) {
    %c0_i32 = arith.constant 0 : i32
    %c0_i32_0 = arith.constant 0 : i32
    %c0_i32_1 = arith.constant 0 : i32
    return %c0_i32, %c0_i32_0 : i32, i32
  }
  func.func @transform_4(%arg0: i32) -> (i32, i32) {
    %c0_i32 = arith.constant 0 : i32
    %c0_i32_0 = arith.constant 0 : i32
    return %arg0, %c0_i32 : i32, i32
  }
}

</mosaic_0001>

<bundles_post_ra>
// kernel: tpu_custom_call.1
= control target key start
LH: loop header
LB: loop body
LE: loop exit
PB: predicated region body
PF: predicated region fallthrough
CT: control target
= control target key end

     0   :  { %9 = vsyncpa [#allocation3], 0  ;;  %s1429_s0 = inlined_call_operand.vmem [shape: f32[8,8], index: 0, kind: input, shape index: {}]   ;;  %s1430_s1 = inlined_call_operand.hbm [shape: f32[8,8], index: 1, kind: input, shape index: {}]   ;;  %s1431_s2 = inlined_call_operand.vmem [shape: f32[8,1], index: 2, kind: input, shape index: {}]   ;;  %s1432_s3 = inlined_call_operand.hbm [shape: f32[560,128], index: 3, kind: input, shape index: {}]   ;;  %s1433_s4 = inlined_call_operand.hbm [shape: f32[8,128], index: 4, kind: output, shape index: {}]  }
   0x1   :  { %10 = vsyncpa [#allocation6], 0 }
   0x2   :  { %11 = vsyncpa [#allocation4], 0  ;;  %s1273_s15 = smov [#allocation2]   ;;  %s1274_s17 = smov [#allocation5]  }
   0x3   :  { %s20_s16 = sshll.u32 %s1273_s15, 4  ;;  %s31_s18 = sshll.u32 %s1274_s17, 4  ;;  %s21_s16 = int_to_ptr.vmem [resolvable:$true] %s20_s16  ;;  %s1313_s18 = int_to_ptr.vmem [resolvable:$true] %s31_s18 }
   0x4   :  { %s1201_s21 = scalar_lea.hbm %s1430_s1, 128 }
   0x5   :  { %p1202_p0 = scmp.ne.s32.totalorder %s1430_s1, %s1201_s21  ;;  %p1205_p1 = scmp.lt.u32.totalorder %s1201_s21, %s1430_s1 }
   0x7   :  { %p1207_p2 = pnand %p1205_p1, %p1202_p0 }
   0x9   :  { %1210 = shalt.err (!%p1207_p2)
}
   0xa   :  { %s1211_s26 = scalar_lea.vmem %s21_s16, 128  ;;  %p1216_p4 = scmp.lt.s32.totalorder %s21_s16, %s21_s16 }
   0xb   :  { %p1212_p3 = scmp.ne.s32.totalorder %s21_s16, %s1211_s26  ;;  %p1217_p5 = scmp.lt.s32.totalorder %s1211_s26, %s1211_s26 }
   0xd   :  { %p1218_p6 = por %p1217_p5, %p1216_p4 }
   0xf   :  { %p1219_p7 = pnand %p1218_p6, %p1212_p3 }
  0x11   :  { %1222 = shalt.err (!%p1219_p7)
}
  0x12   :  { %23 = dma.hbm_to_vmem [thread:$0]  %s1430_s1, 128, %s21_s16, [#allocation3]  }
  0x13   :  { %s1223_s5 = scalar_lea.hbm %s1432_s3, 8960 }
  0x14   :  { %p1224_p8 = scmp.ne.s32.totalorder %s1432_s3, %s1223_s5  ;;  %p1227_p9 = scmp.lt.u32.totalorder %s1223_s5, %s1432_s3 }
  0x16   :  { %p1229_p10 = pnand %p1227_p9, %p1224_p8 }
  0x18   :  { %1232 = shalt.err (!%p1229_p10)
}
  0x19   :  { %s1233_s10 = scalar_lea.vmem %s1313_s18, 8960  ;;  %p1238_p12 = scmp.lt.s32.totalorder %s1313_s18, %s1313_s18 }
  0x1a   :  { %p1234_p11 = scmp.ne.s32.totalorder %s1313_s18, %s1233_s10  ;;  %p1239_p13 = scmp.lt.s32.totalorder %s1233_s10, %s1233_s10 }
  0x1c   :  { %p1240_p0 = por %p1239_p13, %p1238_p12 }
  0x1e   :  { %p1241_p1 = pnand %p1240_p0, %p1234_p11 }
  0x20   :  { %1244 = shalt.err (!%p1241_p1)
}
  0x21   :  { %s1275_s1 = smov 128   ;;  %s1276_s11 = smov 8  }
  0x22   :  { %37 = dma.hbm_to_vmem [thread:$0]  %s1432_s3, 8960, %s1313_s18, [#allocation6], %s1275_s1, %s1275_s1, %s1276_s11  }
  0x23   :  { %1267 = dma.done.wait [#allocation3], 128  }
  0x24   :  { %1268 = vsyncadd [#allocation3], 4294967168 }
  0x25   :  { %1269 = dma.done.wait [#allocation6], 8960  }
  0x26   :  { %1270 = vsyncadd [#allocation6], 4294958336  ;;  %v1277_v0 = vmov 0   ;;  %v45_v1 = vld [vmem:[%s1431_s2] sm:$0xff]  ;;  %v279_v2 = vld [vmem:[#allocation5 + $0x88] sm:$0xff]  ;;  %v1278_v7 = vmov 0.0|0.0  }
  0x27   :  { %1184 = vset.pattern.permute.xlu0 %v1277_v0  ;;  %v280_v3 = vld [vmem:[#allocation5 + $0x90] sm:$0xff]  ;;  %v263_v4 = vld [vmem:[#allocation5 + $0x8] sm:$0xff]  ;;  %1069 = vmatprep.subr.bf16.mxu0 %v1278_v7  ;;  %v281_v9 = vld [vmem:[#allocation5 + $0x98] sm:$0xff]  ;;  %vm1279_vm0 = vmmov 0   ;;  %v1280_v32 = vmov 0.0  }
  0x28   :  { %48 = vperm.xlu0 %1184, %v45_v1   ;;  %v1070_v5 = vpack.c.bf16 %v280_v3, %v279_v2  ;;  %v264_v6 = vld [vmem:[#allocation5 + $0x10] sm:$0xff]  ;;  %1093 = vmatprep.subr.bf16.mxu1 %v1278_v7  ;;  %v282_v10 = vld [vmem:[#allocation5 + $0xa0] sm:$0xff]  ;;  %v265_v11 = vld [vmem:[#allocation5 + $0x18] sm:$0xff]  ;;  %v1281_v1 = vmov 683565275  }
  0x29   :  { %v1094_v8 = vpack.c.bf16 %v264_v6, %v263_v4  ;;  %v1073_v12 = vpack.c.bf16 %v282_v10, %v281_v9  ;;  %v266_v13 = vld [vmem:[#allocation5 + $0x20] sm:$0xff]  ;;  %v283_v15 = vld [vmem:[#allocation5 + $0xa8] sm:$0xff]  ;;  %v284_v16 = vld [vmem:[#allocation5 + $0xb0] sm:$0xff]  ;;  %951 = vmatprep.mubr.msk.f32.mxu0 %vm1279_vm0, %v1280_v32  ;;  %986 = vmatprep.mubr.msk.f32.mxu1 %vm1279_vm0, %v1280_v32  ;;  %v1282_v3 = vmov 2475754826  }
  0x2a   :  { %1071 = vmatpush3.bf16.msra.mxu0 %v1070_v5  ;;  %v1097_v14 = vpack.c.bf16 %v266_v13, %v265_v11  ;;  %v267_v17 = vld [vmem:[#allocation5 + $0x28] sm:$0xff]  ;;  %v1076_v18 = vpack.c.bf16 %v284_v16, %v283_v15  ;;  %v268_v19 = vld [vmem:[#allocation5 + $0x30] sm:$0xff]  ;;  %v285_v21 = vld [vmem:[#allocation5 + $0xb8] sm:$0xff]  ;;  %v1283_v6 = vmov 2131351028  }
  0x2b   :  { %1095 = vmatpush3.bf16.msra.mxu1 %v1094_v8  ;;  %1072 = vmatprep.subr.bf16.mxu0 %v1278_v7  ;;  %v1100_v20 = vpack.c.bf16 %v268_v19, %v267_v17  ;;  %v286_v22 = vld [vmem:[#allocation5 + $0xc0] sm:$0xff]  ;;  %v269_v23 = vld [vmem:[#allocation5 + $0x38] sm:$0xff]  ;;  %v287_v27 = vld [vmem:[#allocation5 + $0xc8] sm:$0xff]  ;;  %v1284_v10 = vmov 2102212464  }
  0x2c   :  { %1096 = vmatprep.subr.bf16.mxu1 %v1278_v7  ;;  %v1079_v24 = vpack.c.bf16 %v286_v22, %v285_v21  ;;  %v270_v25 = vld [vmem:[#allocation5 + $0x40] sm:$0xff]  ;;  %v288_v28 = vld [vmem:[#allocation5 + $0xd0] sm:$0xff]  ;;  %v271_v29 = vld [vmem:[#allocation5 + $0x48] sm:$0xff]  ;;  %v1285_v13 = vmov 920167782  }
  0x2d   :  { %v1103_v26 = vpack.c.bf16 %v270_v25, %v269_v23  ;;  %v1082_v30 = vpack.c.bf16 %v288_v28, %v287_v27  ;;  %v272_v31 = vld [vmem:[#allocation5 + $0x50] sm:$0xff]  ;;  %v289_v34 = vld [vmem:[#allocation5 + $0xd8] sm:$0xff]  ;;  %v290_v35 = vld [vmem:[#allocation5 + $0xe0] sm:$0xff]  ;;  %v1286_v16 = vmov 1326507024  }
  0x2e   :  { %1074 = vmatpush3.bf16.msra.mxu0 %v1073_v12  ;;  %v1106_v33 = vpack.c.bf16 %v272_v31, %v271_v29  ;;  %v273_v36 = vld [vmem:[#allocation5 + $0x58] sm:$0xff]  ;;  %v274_v37 = vld [vmem:[#allocation5 + $0x60] sm:$0xff]  ;;  %v1085_v38 = vpack.c.bf16 %v290_v35, %v289_v34  ;;  %v291_v40 = vld [vmem:[#allocation5 + $0xe8] sm:$0xff] }
  0x2f   :  { %1098 = vmatpush3.bf16.msra.mxu1 %v1097_v14  ;;  %1075 = vmatprep.subr.bf16.mxu0 %v1278_v7  ;;  %v1109_v39 = vpack.c.bf16 %v274_v37, %v273_v36  ;;  %v292_v41 = vld [vmem:[#allocation5 + $0xf0] sm:$0xff]  ;;  %v275_v42 = vld [vmem:[#allocation5 + $0x68] sm:$0xff]  ;;  %v293_v46 = vld [vmem:[#allocation5 + $0xf8] sm:$0xff] }
  0x30   :  { %1099 = vmatprep.subr.bf16.mxu1 %v1278_v7  ;;  %v276_v43 = vld [vmem:[#allocation5 + $0x70] sm:$0xff]  ;;  %v1088_v44 = vpack.c.bf16 %v292_v41, %v291_v40  ;;  %v294_v47 = vld [vmem:[#allocation5 + $0x100] sm:$0xff]  ;;  %v277_v48 = vld [vmem:[#allocation5 + $0x78] sm:$0xff] }
  0x31   :  { %v1112_v45 = vpack.c.bf16 %v276_v43, %v275_v42  ;;  %v278_v49 = vld [vmem:[#allocation5 + $0x80] sm:$0xff]  ;;  %v1091_v50 = vpack.c.bf16 %v294_v47, %v293_v46 }
  0x32   :  { %1077 = vmatpush3.bf16.msra.mxu0 %v1076_v18  ;;  %v1115_v51 = vpack.c.bf16 %v278_v49, %v277_v48  ;;  %v833_v52 = vld [vmem:[#allocation5] ss:$0 sm:$0xff] }
  0x33   :  { %1101 = vmatpush3.bf16.msra.mxu1 %v1100_v20  ;;  %1078 = vmatprep.subr.bf16.mxu0 %v1278_v7 }
  0x34   :  { %1102 = vmatprep.subr.bf16.mxu1 %v1278_v7 }
  0x36   :  { %1080 = vmatpush3.bf16.msra.mxu0 %v1079_v24 }
  0x37   :  { %1104 = vmatpush3.bf16.msra.mxu1 %v1103_v26  ;;  %1081 = vmatprep.subr.bf16.mxu0 %v1278_v7 }
  0x38   :  { %1105 = vmatprep.subr.bf16.mxu1 %v1278_v7 }
  0x3a   :  { %1083 = vmatpush3.bf16.msra.mxu0 %v1082_v30 }
  0x3b   :  { %1107 = vmatpush3.bf16.msra.mxu1 %v1106_v33  ;;  %1084 = vmatprep.subr.bf16.mxu0 %v1278_v7 }
  0x3c   :  { %1108 = vmatprep.subr.bf16.mxu1 %v1278_v7 }
  0x3e   :  { %1086 = vmatpush3.bf16.msra.mxu0 %v1085_v38 }
  0x3f   :  { %1110 = vmatpush3.bf16.msra.mxu1 %v1109_v39  ;;  %1087 = vmatprep.subr.bf16.mxu0 %v1278_v7 }
  0x40   :  { %1111 = vmatprep.subr.bf16.mxu1 %v1278_v7 }
  0x42   :  { %1089 = vmatpush3.bf16.msra.mxu0 %v1088_v44 }
  0x43   :  { %1113 = vmatpush3.bf16.msra.mxu1 %v1112_v45  ;;  %1090 = vmatprep.subr.bf16.mxu0 %v1278_v7 }
  0x44   :  { %1114 = vmatprep.subr.bf16.mxu1 %v1278_v7 }
  0x46   :  { %1092 = vmatpush3.bf16.msra.mxu0 %v1091_v50 }
  0x47   :  { %1116 = vmatpush3.bf16.msra.mxu1 %v1115_v51  ;;  %989 = vmatprep.subr.mxu0 %v1280_v32 }
  0x48   :  { %994 = vmatprep.subr.mxu1 %v1280_v32 }
  0xa7   :  { %v49_v53 = vpop.permute.xlu0 %48 }
  0xa8   :  { %v1369_v54 = vmul.f32 %v833_v52, %v49_v53 }
  0xaa   :  { %v59_v55 = vand.u32 2139095040, %v1369_v54  ;;  %v56_v59 = vand.u32 2147483647, %v1369_v54  ;;  %vm58_vm8 = vcmp.lt.s32.totalorder %v1369_v54, 0 }
  0xac   :  { %v60_v56 = vshrl.u32 %v59_v55, 23  ;;  %v63_v62 = vand.u32 8388607, %v56_v59  ;;  %vm57_vm9 = vcmp.le.f32.partialorder %v56_v59, 0.7853982 }
  0xae   :  { %v834_v57 = vadd.s32 4294967169, %v60_v56  ;;  %v64_v18 = vor.u32 8388608, %v63_v62 }
  0xb0   :  { %v66_v58 = vadd.s32 1, %v834_v57  ;;  %v104_v33 = vshll.u32 %v64_v18, 8 }
  0xb2   :  { %vm67_vm1 = vcmp.gt.s32.totalorder %v66_v58, 0 }
  0xb3   :  { %v68_v60 = vsel %vm67_vm1, %v66_v58, 0  ;;  %vm148_vm1 = vweird.f32 %v1369_v54 }
  0xb4   :  { %v70_v61 = vand.u32 31, %v68_v60  ;;  %v69_v0 = vshrl.u32 %v68_v60, 5 }
  0xb6   :  { %v71_v63 = vsub.s32 32, %v70_v61  ;;  %v73_v2 = vshll.u32 %v1281_v1, %v70_v61  ;;  %v76_v4 = vshll.u32 %v1282_v3, %v70_v61  ;;  %v79_v9 = vshll.u32 %v1283_v6, %v70_v61 }
  0xb7   :  { %v82_v12 = vshll.u32 %v1284_v10, %v70_v61  ;;  %v85_v15 = vshll.u32 %v1285_v13, %v70_v61  ;;  %vm88_vm2 = vcmp.lt.s32.totalorder %v69_v0, 1  ;;  %vm91_vm3 = vcmp.lt.s32.totalorder %v69_v0, 4 }
  0xb8   :  { %v74_v5 = vshrl.u32 %v1282_v3, %v71_v63  ;;  %v77_v8 = vshrl.u32 %v1283_v6, %v71_v63  ;;  %v80_v11 = vshrl.u32 %v1284_v10, %v71_v63  ;;  %v83_v14 = vshrl.u32 %v1285_v13, %v71_v63 }
  0xb9   :  { %v86_v17 = vshrl.u32 %v1286_v16, %v71_v63  ;;  %v72_v27 = vshrl.u32 %v1281_v1, %v71_v63  ;;  %vm90_vm4 = vcmp.lt.s32.totalorder %v69_v0, 3  ;;  %vm89_vm5 = vcmp.lt.s32.totalorder %v69_v0, 2 }
  0xba   :  { %v75_v19 = vor.u32 %v74_v5, %v73_v2  ;;  %v78_v20 = vor.u32 %v77_v8, %v76_v4  ;;  %v81_v21 = vor.u32 %v80_v11, %v79_v9  ;;  %v84_v22 = vor.u32 %v83_v14, %v82_v12 }
  0xbb   :  { %v87_v23 = vor.u32 %v86_v17, %v85_v15 }
  0xbc   :  { %v93_v24 = vsel %vm91_vm3, %v81_v21, 2102212464  ;;  %v96_v25 = vsel %vm88_vm2, %v75_v19, %v78_v20  ;;  %v100_v26 = vsel %vm88_vm2, %v78_v20, %v81_v21  ;;  %v97_v28 = vsel %vm91_vm3, %v84_v22, 920167782 }
  0xbd   :  { %v101_v29 = vsel %vm91_vm3, %v87_v23, 1326507024  ;;  %v98_v30 = vsel %vm90_vm4, %v81_v21, %v97_v28  ;;  %v92_v34 = vsel %vm88_vm2, %v72_v27, %v75_v19  ;;  %v94_v35 = vsel %vm90_vm4, %v78_v20, %v93_v24  ;;  %v464_v27 = vld [vmem:[#allocation5 + $0x118] sm:$0xff]  ;;  %v612_v28 = vld [vmem:[#allocation5 + $0x120] sm:$0xff] }
  0xbe   :  { %v102_v31 = vsel %vm90_vm4, %v84_v22, %v101_v29  ;;  %v99_v36 = vsel %vm89_vm5, %v96_v25, %v98_v30  ;;  %v95_v42 = vsel %vm89_vm5, %v92_v34, %v94_v35  ;;  %v613_v29 = vld [vmem:[#allocation5 + $0x128] sm:$0xff]  ;;  %v463_v30 = vld [vmem:[#allocation2] sm:$0xff]  ;;  %vm465_vm2 = vcmask 64512   ;;  %v614_v34 = vld [vmem:[#allocation5 + $0x130] sm:$0xff] }
  0xbf   :  { %v103_v37 = vsel %vm89_vm5, %v100_v26, %v102_v31  ;;  %v1378_v40 = vmul.u32.u64.low %v104_v33, %v99_v36  ;;  %v1379_v41 = vmul.u32.u64.high %v104_v33, %v99_v36, %v1378_v40  ;;  %v111_v44 = vmul.u32 %v104_v33, %v95_v42  ;;  %v462_v31 = vld [vmem:[#allocation5 + $0x110] sm:$0xff]  ;;  %v615_v35 = vld [vmem:[#allocation5 + $0x138] sm:$0xff] }
  0xc0   :  { %v1375_v38 = vmul.u32.u64.low %v104_v33, %v103_v37  ;;  %v1376_v39 = vmul.u32.u64.high %v104_v33, %v103_v37, %v1375_v38  ;;  %v461_v33 = vld [vmem:[%s1429_s0] sm:$0xff]  ;;  %v1121_v36 = vpack.c.bf16 %v615_v35, %v614_v34  ;;  %v616_v37 = vld [vmem:[#allocation5 + $0x140] sm:$0xff]  ;;  %v734_v34 = vld [vmem:[#allocation5 + $0x1f0] sm:$0xff]  ;;  %s1287_s0 = smov [#allocation7]  }
  0xc1   :  { %v114_v43 = vadd.s32 1, %v1379_v41  ;;  %v617_v38 = vld [vmem:[#allocation5 + $0x148] sm:$0xff]  ;;  %s823_s16 = sshll.u32 %s1287_s0, 4  ;;  %s824_s16 = int_to_ptr.vmem [resolvable:$true] %s823_s16 }
  0xc2   :  { %vm113_vm6 = vc.u32 %v1376_v39, %v1378_v40  ;;  %v112_v57 = vadd.s32 %v1378_v40, %v1376_v39  ;;  %v1124_v39 = vpack.c.bf16 %v617_v38, %v616_v37  ;;  %v618_v40 = vld [vmem:[#allocation5 + $0x150] sm:$0xff]  ;;  %v736_v37 = vld [vmem:[#allocation5 + $0x200] sm:$0xff]  ;;  %v737_v38 = vld [vmem:[#allocation5 + $0x208] sm:$0xff]  ;;  %s1245_s17 = scalar_lea.vmem %s824_s16, 128  ;;  %p1250_p3 = scmp.lt.s32.totalorder %s824_s16, %s824_s16 }
  0xc3   :  { %v115_v45 = vsel %vm113_vm6, %v114_v43, %v1379_v41  ;;  %v619_v41 = vld [vmem:[#allocation5 + $0x158] sm:$0xff]  ;;  %v620_v43 = vld [vmem:[#allocation5 + $0x160] sm:$0xff]  ;;  %p1246_p2 = scmp.ne.s32.totalorder %s824_s16, %s1245_s17  ;;  %p1251_p4 = scmp.lt.s32.totalorder %s1245_s17, %s1245_s17 }
  0xc4   :  { %v116_v46 = vadd.s32 %v115_v45, %v111_v44  ;;  %v1127_v42 = vpack.c.bf16 %v619_v41, %v618_v40  ;;  %v621_v44 = vld [vmem:[#allocation5 + $0x168] sm:$0xff]  ;;  %v738_v40 = vld [vmem:[#allocation5 + $0x210] sm:$0xff] }
  0xc5   :  { %v1130_v45 = vpack.c.bf16 %v621_v44, %v620_v43  ;;  %v1160_v41 = vpack.c.bf16 %v738_v40, %v737_v38  ;;  %v740_v43 = vld [vmem:[#allocation5 + $0x220] sm:$0xff]  ;;  %p1252_p5 = por %p1251_p4, %p1250_p3 }
  0xc6   :  { %v117_v47 = vadd.s32 536870912, %v116_v46 }
  0xc7   :  { %p1253_p6 = pnand %p1252_p5, %p1246_p2 }
  0xc8   :  { %v118_v48 = vshrl.u32 %v117_v47, 30 }
  0xca   :  { %v119_v49 = vshll.u32 %v118_v48, 30  ;;  %v142_v6 = vsub.s32 4, %v118_v48 }
  0xcc   :  { %v120_v50 = vsub.s32 %v116_v46, %v119_v49  ;;  %v143_v10 = vsel %vm58_vm8, %v142_v6, %v118_v48  ;;  %v623_v46 = vld [vmem:[#allocation5 + $0x178] sm:$0xff]  ;;  %v624_v48 = vld [vmem:[#allocation5 + $0x180] sm:$0xff]  ;;  %v625_v49 = vld [vmem:[#allocation5 + $0x188] sm:$0xff] }
  0xcd   :  { %v145_v12 = vsel %vm57_vm9, 0, %v143_v10 }
  0xce   :  { %v122_v51 = vsub.s32 0, %v120_v50  ;;  %v149_v13 = vadd.s32 3, %v145_v12  ;;  %v253_v14 = vand.u32 3, %v145_v12 }
  0xd0   :  { %v835_v52 = vmin.u32 %v122_v51, %v120_v50  ;;  %v150_v15 = vand.u32 3, %v149_v13  ;;  %vm258_vm10 = vcmp.eq.s32.totalorder %v253_v14, 2  ;;  %vm255_vm12 = vcmp.eq.s32.totalorder %v253_v14, 0  ;;  %v626_v51 = vld [vmem:[#allocation5 + $0x190] sm:$0xff] }
  0xd1   :  { %vm254_vm14 = vcmp.lt.s32.totalorder %v253_v14, 2 }
  0xd2   :  { %v124_v53 = vclz %v835_v52  ;;  %vm155_vm11 = vcmp.eq.s32.totalorder %v150_v15, 2  ;;  %vm152_vm13 = vcmp.eq.s32.totalorder %v150_v15, 0  ;;  %vm151_vm15 = vcmp.lt.s32.totalorder %v150_v15, 2  ;;  %v627_v52 = vld [vmem:[#allocation5 + $0x198] sm:$0xff] }
  0xd4   :  { %v836_v55 = vadd.s32 4294967294, %v124_v53  ;;  %v1139_v53 = vpack.c.bf16 %v627_v52, %v626_v51 }
  0xd6   :  { %vm837_vm7 = vcmp.lt.s32.totalorder %v836_v55, 0 }
  0xd7   :  { %v127_v56 = vsel %vm837_vm7, 0, %v836_v55 }
  0xd8   :  { %v128_v58 = vsub.s32 32, %v127_v56  ;;  %v132_v60 = vsub.s32 4294967266, %v127_v56  ;;  %v129_v61 = vshll.u32 %v120_v50, %v127_v56  ;;  %v1136_v50 = vpack.c.bf16 %v625_v49, %v624_v48 }
  0xda   :  { %v130_v62 = vshrl.u32 %v112_v57, %v128_v58  ;;  %v133_v63 = vadd.s32 127, %v132_v60  ;;  %v842_v57 = vld [vmem:[#allocation5 + $0x108] ss:$0 sm:$0xff] }
  0xdc   :  { %v131_v0 = vor.u32 %v130_v62, %v129_v61  ;;  %v134_v1 = vshll.u32 %v133_v63, 23 }
  0xde   :  { %v135_v2 = vor.u32 4788187, %v134_v1  ;;  %v138_v4 = vcvt.s32.f32 %v131_v0 }
  0xe0   :  { %v136_v3 = vand.u32 2147483647, %v135_v2 }
  0xe2   :  { %v139_v5 = vmul.f32 %v138_v4, %v136_v3 }
  0xe4   :  { %v140_v8 = vxor.u32 2147483648, %v139_v5 }
  0xe6   :  { %v141_v9 = vsel %vm58_vm8, %v140_v8, %v139_v5 }
  0xe7   :  { %v144_v11 = vsel %vm57_vm9, %v1369_v54, %v141_v9  ;;  %v1118_v54 = vpack.c.bf16 %v613_v29, %v612_v28  ;;  %v730_v28 = vld [vmem:[#allocation5 + $0x1d0] sm:$0xff] }
  0xe8   :  { %1185 = vcosq.f32 %v144_v11 }
  0xe9   :  { %1187 = vsinq.f32 %v144_v11 }
  0xf2   :  { %v1186_v16 = vpop.eup %1185 }
  0xf3   :  { %v1188_v17 = vpop.eup %1187  ;;  %v156_v18 = vxor.u32 2147483648, %v1186_v16 }
  0xf4   :  { %v153_v19 = vxor.u32 2147483648, %v1188_v17 }
  0xf5   :  { %v260_v20 = vsel %vm258_vm10, %v156_v18, %v1188_v17  ;;  %v157_v21 = vsel %vm155_vm11, %v156_v18, %v1188_v17 }
  0xf6   :  { %v257_v59 = vsel %vm255_vm12, %v1186_v16, %v153_v19  ;;  %v154_v22 = vsel %vm152_vm13, %v1186_v16, %v153_v19 }
  0xf7   :  { %v261_v23 = vsel %vm254_vm14, %v257_v59, %v260_v20  ;;  %v158_v24 = vsel %vm151_vm15, %v154_v22, %v157_v21  ;;  %v725_v59 = vld [vmem:[#allocation5 + $0x1a8] sm:$0xff]  ;;  %v726_v22 = vld [vmem:[#allocation5 + $0x1b0] sm:$0xff] }
  0xf8   :  { %v262_v25 = vsel %vm148_vm1, nan, %v261_v23  ;;  %v159_v26 = vsel %vm148_vm1, nan, %v158_v24  ;;  %v1142_v23 = vpack.c.bf16 %v726_v22, %v725_v59  ;;  %v727_v24 = vld [vmem:[#allocation5 + $0x1b8] sm:$0xff] }
  0xf9   :  { %952 = vmatmul.mubr.f32.vlgmr.msra.gmra.mrb[0].mxu0 %v262_v25  ;;  %987 = vmatmul.mubr.f32.vlgmr.msra.gmra.mrb[0].mxu1 %v159_v26  ;;  %v728_v25 = vld [vmem:[#allocation5 + $0x1c0] sm:$0xff] }
  0xfa   :  { %991 = vmatprep.mubr.msk.f32.mxu0 %vm1279_vm0, %v1280_v32  ;;  %996 = vmatprep.mubr.msk.f32.mxu1 %vm1279_vm0, %v1280_v32  ;;  %v1145_v26 = vpack.c.bf16 %v728_v25, %v727_v24 }
  0xfb   :  { %990 = vmatpush3.msra.mxu0 %v464_v27  ;;  %995 = vmatpush3.msra.mxu1 %v462_v31  ;;  %v729_v27 = vld [vmem:[#allocation5 + $0x1c8] sm:$0xff]  ;;  %v732_v31 = vld [vmem:[#allocation5 + $0x1e0] sm:$0xff] }
  0xfc   :  { %1117 = vmatprep.subr.bf16.mxu0 %v1278_v7  ;;  %1141 = vmatprep.subr.bf16.mxu1 %v1278_v7  ;;  %v1148_v29 = vpack.c.bf16 %v730_v28, %v729_v27 }
  0xfd   :  { %992 = vmatmul.mubr.msk.f32.vlgmr.msra.gmra.mrb[2].mxu0 %vm465_vm2, %v463_v30  ;;  %997 = vmatmul.mubr.msk.f32.vlgmr.msra.gmra.mrb[2].mxu1 %vm465_vm2, %v461_v33  ;;  %v731_v30 = vld [vmem:[#allocation5 + $0x1d8] sm:$0xff]  ;;  %v733_v33 = vld [vmem:[#allocation5 + $0x1e8] sm:$0xff] }
  0xfe   :  { %1119 = vmatpush3.bf16.msra.mxu0 %v1118_v54  ;;  %1031 = vmatprep.mubr.msk.f32.mxu0 %vm1279_vm0, %v1280_v32  ;;  %v1151_v54 = vpack.c.bf16 %v732_v31, %v731_v30  ;;  %v1154_v35 = vpack.c.bf16 %v734_v34, %v733_v33 }
  0xff   :  { %1120 = vmatprep.subr.bf16.mxu0 %v1278_v7  ;;  %1066 = vmatprep.mubr.msk.f32.mxu1 %vm1279_vm0, %v1280_v32  ;;  %v622_v32 = vld [vmem:[#allocation5 + $0x170] sm:$0xff] }
 0x100   :  { %v1133_v47 = vpack.c.bf16 %v623_v46, %v622_v32  ;;  %1143 = vmatpush3.bf16.msra.mxu1 %v1142_v23  ;;  %v845_v32 = vld [vmem:[#allocation5 + $0x1a0] ss:$0 sm:$0xff] }
 0x101   :  { %1144 = vmatprep.subr.bf16.mxu1 %v1278_v7 }
 0x102   :  { %1122 = vmatpush3.bf16.msra.mxu0 %v1121_v36  ;;  %v735_v36 = vld [vmem:[#allocation5 + $0x1f8] sm:$0xff] }
 0x103   :  { %1123 = vmatprep.subr.bf16.mxu0 %v1278_v7 }
 0x104   :  { %1146 = vmatpush3.bf16.msra.mxu1 %v1145_v26 }
 0x105   :  { %1147 = vmatprep.subr.bf16.mxu1 %v1278_v7 }
 0x106   :  { %1125 = vmatpush3.bf16.msra.mxu0 %v1124_v39  ;;  %v1157_v39 = vpack.c.bf16 %v736_v37, %v735_v36 }
 0x107   :  { %1126 = vmatprep.subr.bf16.mxu0 %v1278_v7 }
 0x108   :  { %1149 = vmatpush3.bf16.msra.mxu1 %v1148_v29 }
 0x109   :  { %1150 = vmatprep.subr.bf16.mxu1 %v1278_v7 }
 0x10a   :  { %1128 = vmatpush3.bf16.msra.mxu0 %v1127_v42  ;;  %v739_v42 = vld [vmem:[#allocation5 + $0x218] sm:$0xff] }
 0x10b   :  { %1129 = vmatprep.subr.bf16.mxu0 %v1278_v7  ;;  %v1163_v44 = vpack.c.bf16 %v740_v43, %v739_v42 }
 0x10c   :  { %1152 = vmatpush3.bf16.msra.mxu1 %v1151_v54 }
 0x10d   :  { %1153 = vmatprep.subr.bf16.mxu1 %v1278_v7 }
 0x10e   :  { %1131 = vmatpush3.bf16.msra.mxu0 %v1130_v45 }
 0x10f   :  { %1132 = vmatprep.subr.bf16.mxu0 %v1278_v7 }
 0x110   :  { %1155 = vmatpush3.bf16.msra.mxu1 %v1154_v35 }
 0x111   :  { %1156 = vmatprep.subr.bf16.mxu1 %v1278_v7 }
 0x112   :  { %1134 = vmatpush3.bf16.msra.mxu0 %v1133_v47 }
 0x113   :  { %1135 = vmatprep.subr.bf16.mxu0 %v1278_v7 }
 0x114   :  { %1158 = vmatpush3.bf16.msra.mxu1 %v1157_v39 }
 0x115   :  { %1159 = vmatprep.subr.bf16.mxu1 %v1278_v7 }
 0x116   :  { %1137 = vmatpush3.bf16.msra.mxu0 %v1136_v50 }
 0x117   :  { %1138 = vmatprep.subr.bf16.mxu0 %v1278_v7 }
 0x118   :  { %1161 = vmatpush3.bf16.msra.mxu1 %v1160_v41 }
 0x119   :  { %1162 = vmatprep.subr.bf16.mxu1 %v1278_v7 }
 0x11a   :  { %1140 = vmatpush3.bf16.msra.mxu0 %v1139_v53 }
 0x11c   :  { %1164 = vmatpush3.bf16.msra.mxu1 %v1163_v44 }
 0x1cc   :  { %v361_v55 = vpop.f32.mrb[0].mxu0  ;;  %v431_v56 = vpop.f32.mrb[0].mxu1 }
 0x1cd   :  { %v432_v58 = vadd.f32 %v431_v56, %v361_v55  ;;  %v953_v60 = vpop.f32.mrb[1].mxu0  ;;  %v988_v61 = vpop.f32.mrb[1].mxu1 }
 0x1cf   :  { %v440_v62 = vadd.f32 %v842_v57, %v432_v58 }
 0x1d0   :  { %v535_v17 = vpop.f32.mrb[2].mxu0  ;;  %v608_v19 = vpop.f32.mrb[2].mxu1 }
 0x1d1   :  { %v444_v63 = vand.u32 2147483647, %v440_v62  ;;  %v441_v11 = vmax.f32 %v440_v62, 0.0  ;;  %vm442_vm3 = vcmp.ne.f32.partialorder %v440_v62, %v440_v62  ;;  %v993_v18 = vpop.f32.mrb[3].mxu0  ;;  %v609_v20 = vadd.f32 %v608_v19, %v535_v17  ;;  %v998_v21 = vpop.f32.mrb[3].mxu1 }
 0x1d3   :  { %v445_v0 = vsub.f32 0.0, %v444_v63 }
 0x1d5   :  { %v446_v1 = vmul.f32 1.442695, %v445_v0 }
 0x1d7   :  { %1189 = vpow2.f32 %v446_v1 }
 0x1e1   :  { %v1190_v2 = vpop.eup %1189 }
 0x1e2   :  { %v448_v3 = vadd.f32 1.0, %v1190_v2  ;;  %v451_v4 = vmul.f32 -0.5, %v1190_v2  ;;  %v454_v6 = vand.u32 2147483647, %v1190_v2 }
 0x1e4   :  { %1191 = vlog2.f32 %v448_v3  ;;  %v452_v5 = vadd.f32 1.0, %v451_v4  ;;  %vm455_vm0 = vcmp.lt.f32.partialorder %v454_v6, 0.0004427343  ;;  %v846_v3 = vld [vmem:[#allocation5 + $0x228] ss:$0 sm:$0xff] }
 0x1e6   :  { %v453_v10 = vmul.f32 %v1190_v2, %v452_v5 }
 0x1ee   :  { %v1192_v8 = vpop.eup %1191 }
 0x1ef   :  { %v450_v9 = vmul.f32 0.6931472, %v1192_v8 }
 0x1f1   :  { %v456_v12 = vsel %vm455_vm0, %v453_v10, %v450_v9 }
 0x1f2   :  { %v457_v13 = vadd.f32 %v456_v12, %v441_v11 }
 0x1f4   :  { %v458_v14 = vsel %vm442_vm3, %v440_v62, %v457_v13 }
 0x1f5   :  { %1193 = vtanh.f32 %v458_v14 }
 0x1ff   :  { %v1194_v15 = vpop.eup %1193 }
 0x200   :  { %v460_v16 = vmul.f32 %v1194_v15, %v440_v62 }
 0x202   :  { %1032 = vmatmul.mubr.f32.vlgmr.msra.gmra.mrb[4].mxu0 %v460_v16 }
 0x2d5   :  { %v694_v45 = vpop.f32.mrb[4].mxu0 }
 0x2d6   :  { %v698_v46 = vadd.f32 %v694_v45, %v609_v20  ;;  %v1033_v47 = vpop.f32.mrb[5].mxu0 }
 0x2d8   :  { %v704_v48 = vadd.f32 %v845_v32, %v698_v46 }
 0x2da   :  { %v708_v49 = vand.u32 2147483647, %v704_v48  ;;  %v705_v7 = vmax.f32 %v704_v48, 0.0  ;;  %vm706_vm5 = vcmp.ne.f32.partialorder %v704_v48, %v704_v48 }
 0x2dc   :  { %v709_v50 = vsub.f32 0.0, %v708_v49 }
 0x2de   :  { %v710_v51 = vmul.f32 1.442695, %v709_v50 }
 0x2e0   :  { %1195 = vpow2.f32 %v710_v51 }
 0x2ea   :  { %v1196_v52 = vpop.eup %1195 }
 0x2eb   :  { %v712_v53 = vadd.f32 1.0, %v1196_v52  ;;  %v715_v55 = vmul.f32 -0.5, %v1196_v52  ;;  %v718_v57 = vand.u32 2147483647, %v1196_v52 }
 0x2ed   :  { %1197 = vlog2.f32 %v712_v53  ;;  %v716_v56 = vadd.f32 1.0, %v715_v55  ;;  %vm719_vm4 = vcmp.lt.f32.partialorder %v718_v57, 0.0004427343 }
 0x2ef   :  { %v717_v61 = vmul.f32 %v1196_v52, %v716_v56 }
 0x2f7   :  { %v1198_v58 = vpop.eup %1197 }
 0x2f8   :  { %v714_v60 = vmul.f32 0.6931472, %v1198_v58 }
 0x2fa   :  { %v720_v62 = vsel %vm719_vm4, %v717_v61, %v714_v60 }
 0x2fb   :  { %v721_v63 = vadd.f32 %v720_v62, %v705_v7 }
 0x2fd   :  { %v722_v0 = vsel %vm706_vm5, %v704_v48, %v721_v63 }
 0x2fe   :  { %1199 = vtanh.f32 %v722_v0 }
 0x308   :  { %v1200_v1 = vpop.eup %1199 }
 0x309   :  { %v724_v2 = vmul.f32 %v1200_v1, %v704_v48 }
 0x30b   :  { %1067 = vmatmul.mubr.f32.vlgmr.msra.gmra.mrb[4].mxu1 %v724_v2 }
 0x3de   :  { %v812_v4 = vpop.f32.mrb[4].mxu1 }
 0x3df   :  { %v813_v5 = vadd.f32 %v846_v3, %v812_v4  ;;  %v1068_v6 = vpop.f32.mrb[5].mxu1 }
 0x3e1   :  { %816 = vst [vmem:[#allocation7] sm:$0xff] %v813_v5 }
 0x3e2   :  { %1256 = shalt.err (!%p1253_p6)
}
 0x3e3   :  { %s1257_s20 = scalar_lea.hbm %s1433_s4, 128 }
 0x3e4   :  { %p1258_p7 = scmp.ne.s32.totalorder %s1433_s4, %s1257_s20  ;;  %p1261_p8 = scmp.lt.u32.totalorder %s1257_s20, %s1433_s4 }
 0x3e6   :  { %p1263_p9 = pnand %p1261_p8, %p1258_p7 }
 0x3e8   :  { %1266 = shalt.err (!%p1263_p9)
}
 0x3e9   :  { %826 = dma.vmem_to_hbm [thread:$0]  %s824_s16, 128, %s1433_s4, [#allocation4]  }
 0x3ea   :  { %1271 = dma.done.wait [#allocation4], 128  }
 0x3eb   :  { %1272 = vsyncadd [#allocation4], 4294967168 }
 0x3ec   :  { %830 = vsyncpa [#allocation3], 1 }
 0x3ed   :  { %831 = vsyncpa [#allocation6], 1 }
 0x3ee   :  { %832 = vsyncpa [#allocation4], 1 }

</bundles_post_ra>
